<compile_context>
chip_gen: v5e
topology: v5e:2x2
jax: 0.10.0
libtpu: 0.0.40
codegen_flags: <defaults>
</compile_context>

<pallas_src>
import jax
import jax.numpy as jnp
from jax.experimental import pallas as pl
from jax.experimental.pallas import tpu as pltpu


_VMEM_LIMIT = 32 * 1024 * 1024   # raises v5e's 16 MiB default; == v6e/v7x default


def _pick_tile(dim, max_tile=512):
    """Largest tile <= max_tile that divides `dim` exactly (else the full dim).

    Exact divisors keep partial-block masking and BN-statistic padding out of
    the kernels; tiled sizes are multiples of 128 (lanes) / 8 (sublanes).
    """
    if dim <= max_tile:
        return dim
    for t in (max_tile, 256, 128):
        if dim % t == 0:
            return t
    return dim


# ---------------------------------------------------------------------------
# Pallas kernels.
# Layout convention: channels on sublanes, pixels on lanes, so every matmul is
#   W(C_out, K) @ P(K, M_pixels)  ->  (C_out, M_pixels).
# ---------------------------------------------------------------------------
def _down_kernel(w_ref, p_ref, b_ref, o_ref, acc_ref):
    """Down path: out = ReLU( W1 @ patches + b1 ), K-tiled, f32 accumulator.

    (LeakyReLU is applied once on the input before im2col, outside the kernel,
    to avoid doing it 16x on duplicated patch elements.)
    """
    k_id = pl.program_id(1)

    @pl.when(k_id == 0)
    def _():
        acc_ref[...] = jnp.zeros_like(acc_ref)

    acc_ref[...] += jnp.dot(w_ref[...], p_ref[...],
                            preferred_element_type=jnp.float32)

    @pl.when(k_id == pl.num_programs(1) - 1)
    def _():
        o_ref[...] = jnp.maximum(acc_ref[...] + b_ref[...], 0.0).astype(o_ref.dtype)


def _down_matmul(w1m, patches, b1_col, c, kk, m):
    tm = _pick_tile(m)
    tk = _pick_tile(kk)
    grid = (m // tm, kk // tk)
    return pl.pallas_call(
        _down_kernel,
        out_shape=jax.ShapeDtypeStruct((c, m), jnp.bfloat16),
        grid_spec=pltpu.PrefetchScalarGridSpec(
            num_scalar_prefetch=0,
            grid=grid,
            in_specs=[
                pl.BlockSpec((c, tk), lambda i, k: (0, k)),    # W1m (C, K)  bf16
                pl.BlockSpec((tk, tm), lambda i, k: (k, i)),   # P1  (K, M)  bf16
                pl.BlockSpec((c, 1), lambda i, k: (0, 0)),     # b1  (C, 1)  f32
            ],
            out_specs=pl.BlockSpec((c, tm), lambda i, k: (0, i)),
            scratch_shapes=[pltpu.VMEM((c, tm), jnp.float32)],
        ),
        compiler_params=pltpu.CompilerParams(
            dimension_semantics=("parallel", "arbitrary"),
            vmem_limit_bytes=_VMEM_LIMIT,
        ),
    )(w1m, patches, b1_col)


def _up_kernel(w_ref, p_ref, z_ref, psum_ref, psq_ref):
    """Up path: per-parity polyphase transposed-conv matmul + BN statistics.

    z = W2[parity] @ P2[parity]  (pre-BatchNorm; bias b2 dropped -- it is
    exactly cancelled by the BN mean subtraction).  Per-channel sum and
    sum-of-squares accumulate in the parity-resident stat outputs across the
    pixel-tile (inner, "arbitrary") grid axis.
    """
    m_id = pl.program_id(1)

    @pl.when(m_id == 0)
    def _():
        psum_ref[...] = jnp.zeros_like(psum_ref)
        psq_ref[...] = jnp.zeros_like(psq_ref)

    z = jnp.dot(w_ref[...], p_ref[...], preferred_element_type=jnp.float32)
    z_ref[...] = z
    psum_ref[...] += jnp.sum(z, axis=1, keepdims=True)
    psq_ref[...] += jnp.sum(z * z, axis=1, keepdims=True)


def _up_matmul(w2m, p2, cout, kk, m):
    tm = _pick_tile(m)
    grid = (4, m // tm)                       # (output parity, pixel tiles)
    return pl.pallas_call(
        _up_kernel,
        out_shape=(
            jax.ShapeDtypeStruct((4, cout, m), jnp.float32),   # pre-BN output
            jax.ShapeDtypeStruct((4, cout, 1), jnp.float32),   # per-parity sum
            jax.ShapeDtypeStruct((4, cout, 1), jnp.float32),   # per-parity sum sq
        ),
        grid_spec=pltpu.PrefetchScalarGridSpec(
            num_scalar_prefetch=0,
            grid=grid,
            in_specs=[
                pl.BlockSpec((None, cout, kk), lambda p, i: (p, 0, 0)),  # W2m bf16
                pl.BlockSpec((None, kk, tm), lambda p, i: (p, 0, i)),    # P2  bf16
            ],
            out_specs=(
                pl.BlockSpec((None, cout, tm), lambda p, i: (p, 0, i)),
                pl.BlockSpec((None, cout, 1), lambda p, i: (p, 0, 0)),
                pl.BlockSpec((None, cout, 1), lambda p, i: (p, 0, 0)),
            ),
        ),
        compiler_params=pltpu.CompilerParams(
            dimension_semantics=("parallel", "arbitrary"),
            vmem_limit_bytes=_VMEM_LIMIT,
        ),
    )(w2m, p2)


# ---------------------------------------------------------------------------
# Parameter preparation (done ONCE, not per forward call).
# ---------------------------------------------------------------------------
def prepare_params(raw):
    """Reshape / re-layout PyTorch-style parameters into kernel layout."""
    w1, w2 = raw["w1"], raw["w2"]            # (C,C,4,4), (C,cout,4,4)
    cin = w1.shape[1]
    cout = w2.shape[1]

    # down conv: rows = out channel, cols = (ci, kh, kw)
    w1m = w1.reshape(w1.shape[0], cin * 16).astype(jnp.bfloat16)

    # ConvTranspose polyphase weights.  For output parity (pi, pj) the taps
    # (dh, dw in {0,1}) hit kernel positions sel[pi][dh] x sel[pj][dw].
    sel = ((3, 1), (2, 0))
    blocks = []
    for pi in (0, 1):
        for pj in (0, 1):
            wp = w2[:, :, jnp.array(sel[pi])][:, :, :, jnp.array(sel[pj])]  # (ci,co,2,2)
            blocks.append(wp.transpose(1, 0, 2, 3).reshape(cout, cin * 4))
    w2m = jnp.stack(blocks, axis=0).astype(jnp.bfloat16)                    # (4,co,C*4)

    return dict(
        w1m=w1m,
        b1=raw["b1"].reshape(-1, 1).astype(jnp.float32),
        w2m=w2m,
        # NOTE: b2 intentionally dropped — a bias added immediately before
        # BatchNorm is exactly cancelled by the mean subtraction.
        gamma=raw["gamma"].reshape(-1, 1).astype(jnp.float32),
        beta=raw["beta"].reshape(-1, 1).astype(jnp.float32),
    )


# ---------------------------------------------------------------------------
# Forward pass.
# ---------------------------------------------------------------------------
def self_assembly_forward(x, params):
    """Innermost Self_assembly forward.  x: (1, C, H, W) float32 (NCHW)."""
    n, c, h, w = x.shape
    assert n == 1, "torch.cat([x_latter, x[0:1]], 1) requires batch size 1"
    w1m, b1 = params["w1m"], params["b1"]
    w2m = params["w2m"]
    gamma, beta = params["gamma"], params["beta"]
    cout = w2m.shape[1]

    # ---- down path: LeakyReLU (once) + dilated Conv2d (+ fused bias/ReLU) ----
    k1, s1, p1, d1 = 4, 2, 3, 2
    oh1 = (h + 2 * p1 - d1 * (k1 - 1) - 1) // s1 + 1
    ow1 = (w + 2 * p1 - d1 * (k1 - 1) - 1) // s1 + 1
    m1 = oh1 * ow1
    kk1 = c * k1 * k1

    xl = jnp.where(x[0] >= 0.0, x[0], 0.2 * x[0]).astype(jnp.bfloat16)
    xp = jnp.pad(xl, ((0, 0), (p1, p1), (p1, p1)))
    ih = (jnp.arange(k1) * d1)[:, None] + (jnp.arange(oh1) * s1)[None, :]
    iw = (jnp.arange(k1) * d1)[:, None] + (jnp.arange(ow1) * s1)[None, :]
    # TODO(synk): im2col gather still runs in XLA; a fully in-kernel gather via
    #             strided pl.ds loads would remove this HBM blow-up as well.
    p1_pat = xp[:, ih[:, None, :, None], iw[None, :, None, :]].reshape(kk1, m1)

    y1 = _down_matmul(w1m, p1_pat, b1, c, kk1, m1)          # (C, m1) bf16
    y1 = y1.reshape(c, oh1, ow1)

    # ---- up path: polyphase ConvTranspose2d (4 parities) + BatchNorm ----
    y1p = jnp.pad(y1, ((0, 0), (1, 1), (1, 1)))             # halo of 1
    slabs = []
    for pi in (0, 1):
        for pj in (0, 1):
            blk = [y1p[:, pi + dh: pi + dh + oh1, pj + dw: pj + dw + ow1]
                   for dh in (0, 1) for dw in (0, 1)]
            slabs.append(jnp.stack(blk, axis=1).reshape(c * 4, m1))
    p2 = jnp.stack(slabs, axis=0)                           # (4, C*4, m1) bf16

    z, psum, psq = _up_matmul(w2m, p2, cout, c * 4, m1)     # f32

    # finalize BatchNorm (training-mode batch stats, biased var, eps=1e-5)
    n_tot = 4.0 * m1                                        # = H_out * W_out
    mean = jnp.sum(psum, axis=0) / n_tot                    # (cout, 1)
    var = jnp.sum(psq, axis=0) / n_tot - mean * mean
    scale = gamma * jax.lax.rsqrt(var + 1e-5)
    shift = beta - mean * scale

    # affine + parity interleave into NCHW in a single fused writeback pass
    y2 = (scale.reshape(1, 1, cout, 1, 1) * z.reshape(2, 2, cout, oh1, ow1)
          + shift.reshape(1, 1, cout, 1, 1))
    x_latter = y2.transpose(2, 3, 0, 4, 1).reshape(1, cout, 2 * oh1, 2 * ow1)

    # ---- skip connection: x[0, :256].unsqueeze(0), concat on channels ----
    x_res = x[:, :256]
    assert x_latter.shape[2:] == x_res.shape[2:]
    # TODO(synk): F.upsample(..., mode='bilinear') branch when spatial sizes
    #             differ (unreachable for stride-2 down followed by stride-2 up).
    return jnp.concatenate([x_latter, x_res], axis=1)


# ---------------------------------------------------------------------------
# Raw (PyTorch-layout) parameters + pure-JAX reference for correctness check.
# ---------------------------------------------------------------------------
def init_params(key, input_nc, inner_nc, outer_nc):
    assert inner_nc == input_nc, "innermost branch requires inner_nc == input_nc"
    ks = jax.random.split(key, 6)
    return dict(
        w1=0.1 * jax.random.normal(ks[0], (input_nc, input_nc, 4, 4), jnp.float32),
        b1=0.1 * jax.random.normal(ks[1], (input_nc,), jnp.float32),
        w2=0.1 * jax.random.normal(ks[2], (inner_nc, outer_nc, 4, 4), jnp.float32),
        b2=0.1 * jax.random.normal(ks[3], (outer_nc,), jnp.float32),
        gamma=1.0 + 0.1 * jax.random.normal(ks[4], (outer_nc,), jnp.float32),
        beta=0.1 * jax.random.normal(ks[5], (outer_nc,), jnp.float32),
    )


def _reference_forward(x, raw):
    """Pure-JAX f32 reference of the innermost Self_assembly forward."""
    xl = jnp.where(x >= 0.0, x, 0.2 * x)
    y1 = jax.lax.conv_general_dilated(
        xl, raw["w1"], window_strides=(2, 2), padding=((3, 3), (3, 3)),
        rhs_dilation=(2, 2), dimension_numbers=("NCHW", "OIHW", "NCHW"),
        precision=jax.lax.Precision.HIGHEST)
    y1 = jnp.maximum(y1 + raw["b1"][None, :, None, None], 0.0)
    w2f = jnp.flip(raw["w2"], axis=(2, 3)).transpose(1, 0, 2, 3)
    y2 = jax.lax.conv_general_dilated(
        y1, w2f, window_strides=(1, 1), padding=((2, 2), (2, 2)),
        lhs_dilation=(2, 2), dimension_numbers=("NCHW", "OIHW", "NCHW"),
        precision=jax.lax.Precision.HIGHEST)
    y2 = y2 + raw["b2"][None, :, None, None]
    mean = jnp.mean(y2, axis=(0, 2, 3), keepdims=True)
    var = jnp.mean(jnp.square(y2 - mean), axis=(0, 2, 3), keepdims=True)
    y2 = (raw["gamma"][None, :, None, None] * (y2 - mean) * jax.lax.rsqrt(var + 1e-5)
          + raw["beta"][None, :, None, None])
    return jnp.concatenate([y2, x[:, :256]], axis=1)


if __name__ == "__main__":
    key = jax.random.PRNGKey(0)
    k_x, k_p = jax.random.split(key)

    # batch must be 1: the module's skip path is x[0, :256].unsqueeze(0)
    batch, input_nc, inner_nc, outer_nc, spatial = 1, 4, 4, 4, 16
    x = jax.random.normal(k_x, (batch, input_nc, spatial, spatial), jnp.float32)
    raw = init_params(k_p, input_nc, inner_nc, outer_nc)
    params = prepare_params(raw)

    out = jax.jit(self_assembly_forward)(x, params)
    out = jax.block_until_ready(out)

    assert out.shape == (1, outer_nc + min(input_nc, 256), spatial, spatial), out.shape
    assert bool(jnp.all(jnp.isfinite(out)))

    # correctness vs. pure-JAX f32 reference (loose tol: bf16 MXU operands)
    ref = _reference_forward(x, raw)
    err = float(jnp.max(jnp.abs(out - ref)))
    assert err < 0.15, f"max abs error vs reference = {err}"

    print("KERNEL_OK")
</pallas_src>

<mosaic_0001>
module attributes {stable_mosaic.version = 11 : i64} {
  func.func @_down_kernel(%arg0: i32, %arg1: i32, %arg2: memref<4x64xbf16, #tpu.memory_space<vmem>>, %arg3: memref<64x64xbf16, #tpu.memory_space<vmem>>, %arg4: memref<4x1xf32, #tpu.memory_space<vmem>>, %arg5: memref<4x64xbf16, #tpu.memory_space<vmem>>, %arg6: memref<4x64xf32, #tpu.memory_space<vmem>>) attributes {dimension_semantics = [#tpu.dimension_semantics<parallel>, #tpu.dimension_semantics<arbitrary>], iteration_bounds = array<i64: 1, 1>, scalar_prefetch = 0 : i64, scratch_operands = 1 : i64, tpu.core_type = #tpu.core_type<tc>, window_params = [{transform_indices = @transform_0, window_bounds = array<i64: 4, 64>}, {transform_indices = @transform_1, window_bounds = array<i64: 64, 64>}, {pipeline_mode = #tpu.pipeline_mode<synchronous>, transform_indices = @transform_2, window_bounds = array<i64: 4, 1>}, {transform_indices = @transform_3, window_bounds = array<i64: 4, 64>}]} {
    %c0_i32 = arith.constant 0 : i32
    %0 = arith.cmpi eq, %arg1, %c0_i32 : i32
    %1 = arith.extui %0 : i1 to i32
    %c0_i32_0 = arith.constant 0 : i32
    %2 = arith.cmpi ne, %1, %c0_i32_0 : i32
    scf.if %2 {
      %cst_10 = arith.constant 0.000000e+00 : f32
      %12 = vector.broadcast %cst_10 : f32 to vector<4x64xf32>
      %c0_11 = arith.constant 0 : index
      %c0_12 = arith.constant 0 : index
      %13 = vector.load %arg6[%c0_11, %c0_12] : memref<4x64xf32, #tpu.memory_space<vmem>>, vector<4x64xf32>
      tpu.vector_store %arg6[%c0_11, %c0_12], %12 {strides = array<i32>} : memref<4x64xf32, #tpu.memory_space<vmem>>, vector<4x64xf32>,
    } else {
    }
    %c0 = arith.constant 0 : index
    %c0_1 = arith.constant 0 : index
    %3 = vector.load %arg6[%c0, %c0_1] : memref<4x64xf32, #tpu.memory_space<vmem>>, vector<4x64xf32>
    %c0_2 = arith.constant 0 : index
    %c0_3 = arith.constant 0 : index
    %4 = vector.load %arg2[%c0_2, %c0_3] : memref<4x64xbf16, #tpu.memory_space<vmem>>, vector<4x64xbf16>
    %c0_4 = arith.constant 0 : index
    %c0_5 = arith.constant 0 : index
    %5 = vector.load %arg3[%c0_4, %c0_5] : memref<64x64xbf16, #tpu.memory_space<vmem>>, vector<64x64xbf16>
    %cst = arith.constant dense<0.000000e+00> : vector<4x64xf32>
    %6 = tpu.matmul %4, %5, %cst {dimension_numbers = #tpu.dot_dimension_numbers<[1], [0], [0], [1], [0, 0, 1, 1], [], []>} : vector<4x64xbf16>, vector<64x64xbf16>, vector<4x64xf32> -> vector<4x64xf32>
    %7 = arith.addf %3, %6 : vector<4x64xf32>
    %c0_6 = arith.constant 0 : index
    %c0_7 = arith.constant 0 : index
    %8 = vector.load %arg6[%c0_6, %c0_7] : memref<4x64xf32, #tpu.memory_space<vmem>>, vector<4x64xf32>
    tpu.vector_store %arg6[%c0_6, %c0_7], %7 {strides = array<i32>} : memref<4x64xf32, #tpu.memory_space<vmem>>, vector<4x64xf32>,
    %c0_i32_8 = arith.constant 0 : i32
    %9 = arith.cmpi eq, %arg1, %c0_i32_8 : i32
    %10 = arith.extui %9 : i1 to i32
    %c0_i32_9 = arith.constant 0 : i32
    %11 = arith.cmpi ne, %10, %c0_i32_9 : i32
    scf.if %11 {
      %c0_10 = arith.constant 0 : index
      %c0_11 = arith.constant 0 : index
      %12 = vector.load %arg6[%c0_10, %c0_11] : memref<4x64xf32, #tpu.memory_space<vmem>>, vector<4x64xf32>
      %c0_12 = arith.constant 0 : index
      %c0_13 = arith.constant 0 : index
      %13 = vector.load %arg4[%c0_12, %c0_13] : memref<4x1xf32, #tpu.memory_space<vmem>>, vector<4x1xf32>
      %14 = vector.broadcast %13 : vector<4x1xf32> to vector<4x64xf32>
      %15 = arith.addf %12, %14 : vector<4x64xf32>
      %cst_14 = arith.constant 0.000000e+00 : f32
      %16 = vector.broadcast %cst_14 : f32 to vector<4x64xf32>
      %17 = arith.maximumf %15, %16 : vector<4x64xf32>
      %18 = arith.truncf %17 : vector<4x64xf32> to vector<4x64xbf16>
      %c0_15 = arith.constant 0 : index
      %c0_16 = arith.constant 0 : index
      %19 = vector.load %arg5[%c0_15, %c0_16] : memref<4x64xbf16, #tpu.memory_space<vmem>>, vector<4x64xbf16>
      tpu.vector_store %arg5[%c0_15, %c0_16], %18 {strides = array<i32>} : memref<4x64xbf16, #tpu.memory_space<vmem>>, vector<4x64xbf16>,
    } else {
    }
    return
  }
  func.func @transform_0(%arg0: i32, %arg1: i32) -> (i32, i32) {
    %c0_i32 = arith.constant 0 : i32
    %c0_i32_0 = arith.constant 0 : i32
    return %c0_i32, %arg1 : i32, i32
  }
  func.func @transform_1(%arg0: i32, %arg1: i32) -> (i32, i32) {
    %c0_i32 = arith.constant 0 : i32
    return %arg1, %arg0 : i32, i32
  }
  func.func @transform_2(%arg0: i32, %arg1: i32) -> (i32, i32) {
    %c0_i32 = arith.constant 0 : i32
    %c0_i32_0 = arith.constant 0 : i32
    %c0_i32_1 = arith.constant 0 : i32
    return %c0_i32, %c0_i32_0 : i32, i32
  }
  func.func @transform_3(%arg0: i32, %arg1: i32) -> (i32, i32) {
    %c0_i32 = arith.constant 0 : i32
    %c0_i32_0 = arith.constant 0 : i32
    return %c0_i32, %arg0 : i32, i32
  }
}

module attributes {stable_mosaic.version = 11 : i64} {
  func.func @_up_kernel(%arg0: i32, %arg1: i32, %arg2: memref<1x4x16xbf16, #tpu.memory_space<vmem>>, %arg3: memref<1x16x64xbf16, #tpu.memory_space<vmem>>, %arg4: memref<1x4x64xf32, #tpu.memory_space<vmem>>, %arg5: memref<1x4x1xf32, #tpu.memory_space<vmem>>, %arg6: memref<1x4x1xf32, #tpu.memory_space<vmem>>) attributes {dimension_semantics = [#tpu.dimension_semantics<parallel>, #tpu.dimension_semantics<arbitrary>], iteration_bounds = array<i64: 4, 1>, scalar_prefetch = 0 : i64, scratch_operands = 0 : i64, tpu.core_type = #tpu.core_type<tc>, window_params = [{transform_indices = @transform_0, window_bounds = array<i64: 1, 4, 16>}, {transform_indices = @transform_1, window_bounds = array<i64: 1, 16, 64>}, {transform_indices = @transform_2, window_bounds = array<i64: 1, 4, 64>}, {transform_indices = @transform_3, window_bounds = array<i64: 1, 4, 1>}, {transform_indices = @transform_4, window_bounds = array<i64: 1, 4, 1>}]} {
    %c0_i32 = arith.constant 0 : i32
    %0 = arith.cmpi eq, %arg1, %c0_i32 : i32
    %1 = arith.extui %0 : i1 to i32
    %c0_i32_0 = arith.constant 0 : i32
    %2 = arith.cmpi ne, %1, %c0_i32_0 : i32
    scf.if %2 {
      %cst_23 = arith.constant 0.000000e+00 : f32
      %28 = vector.broadcast %cst_23 : f32 to vector<4x1xf32>
      %c0_24 = arith.constant 0 : index
      %c0_25 = arith.constant 0 : index
      %c0_26 = arith.constant 0 : index
      %29 = vector.load %arg5[%c0_24, %c0_25, %c0_26] : memref<1x4x1xf32, #tpu.memory_space<vmem>>, vector<1x4x1xf32>
      %30 = vector.shape_cast %29 : vector<1x4x1xf32> to vector<4x1xf32>
      %31 = vector.shape_cast %28 : vector<4x1xf32> to vector<1x4x1xf32>
      tpu.vector_store %arg5[%c0_24, %c0_25, %c0_26], %31 {strides = array<i32>} : memref<1x4x1xf32, #tpu.memory_space<vmem>>, vector<1x4x1xf32>,
      %cst_27 = arith.constant 0.000000e+00 : f32
      %32 = vector.broadcast %cst_27 : f32 to vector<4x1xf32>
      %c0_28 = arith.constant 0 : index
      %c0_29 = arith.constant 0 : index
      %c0_30 = arith.constant 0 : index
      %33 = vector.load %arg6[%c0_28, %c0_29, %c0_30] : memref<1x4x1xf32, #tpu.memory_space<vmem>>, vector<1x4x1xf32>
      %34 = vector.shape_cast %33 : vector<1x4x1xf32> to vector<4x1xf32>
      %35 = vector.shape_cast %32 : vector<4x1xf32> to vector<1x4x1xf32>
      tpu.vector_store %arg6[%c0_28, %c0_29, %c0_30], %35 {strides = array<i32>} : memref<1x4x1xf32, #tpu.memory_space<vmem>>, vector<1x4x1xf32>,
    } else {
    }
    %c0 = arith.constant 0 : index
    %c0_1 = arith.constant 0 : index
    %c0_2 = arith.constant 0 : index
    %3 = vector.load %arg2[%c0, %c0_1, %c0_2] : memref<1x4x16xbf16, #tpu.memory_space<vmem>>, vector<1x4x16xbf16>
    %4 = vector.shape_cast %3 : vector<1x4x16xbf16> to vector<4x16xbf16>
    %c0_3 = arith.constant 0 : index
    %c0_4 = arith.constant 0 : index
    %c0_5 = arith.constant 0 : index
    %5 = vector.load %arg3[%c0_3, %c0_4, %c0_5] : memref<1x16x64xbf16, #tpu.memory_space<vmem>>, vector<1x16x64xbf16>
    %6 = vector.shape_cast %5 : vector<1x16x64xbf16> to vector<16x64xbf16>
    %cst = arith.constant dense<0.000000e+00> : vector<4x64xf32>
    %7 = tpu.matmul %4, %6, %cst {dimension_numbers = #tpu.dot_dimension_numbers<[1], [0], [0], [1], [0, 0, 1, 1], [], []>} : vector<4x16xbf16>, vector<16x64xbf16>, vector<4x64xf32> -> vector<4x64xf32>
    %c0_6 = arith.constant 0 : index
    %c0_7 = arith.constant 0 : index
    %c0_8 = arith.constant 0 : index
    %8 = vector.load %arg4[%c0_6, %c0_7, %c0_8] : memref<1x4x64xf32, #tpu.memory_space<vmem>>, vector<1x4x64xf32>
    %9 = vector.shape_cast %8 : vector<1x4x64xf32> to vector<4x64xf32>
    %10 = vector.shape_cast %7 : vector<4x64xf32> to vector<1x4x64xf32>
    tpu.vector_store %arg4[%c0_6, %c0_7, %c0_8], %10 {strides = array<i32>} : memref<1x4x64xf32, #tpu.memory_space<vmem>>, vector<1x4x64xf32>,
    %c0_9 = arith.constant 0 : index
    %c0_10 = arith.constant 0 : index
    %c0_11 = arith.constant 0 : index
    %11 = vector.load %arg5[%c0_9, %c0_10, %c0_11] : memref<1x4x1xf32, #tpu.memory_space<vmem>>, vector<1x4x1xf32>
    %12 = vector.shape_cast %11 : vector<1x4x1xf32> to vector<4x1xf32>
    %cst_12 = arith.constant dense<0.000000e+00> : vector<4xf32>
    %13 = vector.multi_reduction <add>, %7, %cst_12 [1] : vector<4x64xf32> to vector<4xf32>
    %14 = vector.shape_cast %13 : vector<4xf32> to vector<4x1xf32>
    %15 = arith.addf %12, %14 : vector<4x1xf32>
    %c0_13 = arith.constant 0 : index
    %c0_14 = arith.constant 0 : index
    %c0_15 = arith.constant 0 : index
    %16 = vector.load %arg5[%c0_13, %c0_14, %c0_15] : memref<1x4x1xf32, #tpu.memory_space<vmem>>, vector<1x4x1xf32>
    %17 = vector.shape_cast %16 : vector<1x4x1xf32> to vector<4x1xf32>
    %18 = vector.shape_cast %15 : vector<4x1xf32> to vector<1x4x1xf32>
    tpu.vector_store %arg5[%c0_13, %c0_14, %c0_15], %18 {strides = array<i32>} : memref<1x4x1xf32, #tpu.memory_space<vmem>>, vector<1x4x1xf32>,
    %c0_16 = arith.constant 0 : index
    %c0_17 = arith.constant 0 : index
    %c0_18 = arith.constant 0 : index
    %19 = vector.load %arg6[%c0_16, %c0_17, %c0_18] : memref<1x4x1xf32, #tpu.memory_space<vmem>>, vector<1x4x1xf32>
    %20 = vector.shape_cast %19 : vector<1x4x1xf32> to vector<4x1xf32>
    %21 = arith.mulf %7, %7 : vector<4x64xf32>
    %cst_19 = arith.constant dense<0.000000e+00> : vector<4xf32>
    %22 = vector.multi_reduction <add>, %21, %cst_19 [1] : vector<4x64xf32> to vector<4xf32>
    %23 = vector.shape_cast %22 : vector<4xf32> to vector<4x1xf32>
    %24 = arith.addf %20, %23 : vector<4x1xf32>
    %c0_20 = arith.constant 0 : index
    %c0_21 = arith.constant 0 : index
    %c0_22 = arith.constant 0 : index
    %25 = vector.load %arg6[%c0_20, %c0_21, %c0_22] : memref<1x4x1xf32, #tpu.memory_space<vmem>>, vector<1x4x1xf32>
    %26 = vector.shape_cast %25 : vector<1x4x1xf32> to vector<4x1xf32>
    %27 = vector.shape_cast %24 : vector<4x1xf32> to vector<1x4x1xf32>
    tpu.vector_store %arg6[%c0_20, %c0_21, %c0_22], %27 {strides = array<i32>} : memref<1x4x1xf32, #tpu.memory_space<vmem>>, vector<1x4x1xf32>,
    return
  }
  func.func @transform_0(%arg0: i32, %arg1: i32) -> (i32, i32, i32) {
    %c0_i32 = arith.constant 0 : i32
    %c0_i32_0 = arith.constant 0 : i32
    %c0_i32_1 = arith.constant 0 : i32
    return %arg0, %c0_i32, %c0_i32_0 : i32, i32, i32
  }
  func.func @transform_1(%arg0: i32, %arg1: i32) -> (i32, i32, i32) {
    %c0_i32 = arith.constant 0 : i32
    %c0_i32_0 = arith.constant 0 : i32
    return %arg0, %c0_i32, %arg1 : i32, i32, i32
  }
  func.func @transform_2(%arg0: i32, %arg1: i32) -> (i32, i32, i32) {
    %c0_i32 = arith.constant 0 : i32
    %c0_i32_0 = arith.constant 0 : i32
    return %arg0, %c0_i32, %arg1 : i32, i32, i32
  }
  func.func @transform_3(%arg0: i32, %arg1: i32) -> (i32, i32, i32) {
    %c0_i32 = arith.constant 0 : i32
    %c0_i32_0 = arith.constant 0 : i32
    %c0_i32_1 = arith.constant 0 : i32
    return %arg0, %c0_i32, %c0_i32_0 : i32, i32, i32
  }
  func.func @transform_4(%arg0: i32, %arg1: i32) -> (i32, i32, i32) {
    %c0_i32 = arith.constant 0 : i32
    %c0_i32_0 = arith.constant 0 : i32
    %c0_i32_1 = arith.constant 0 : i32
    return %arg0, %c0_i32, %c0_i32_0 : i32, i32, i32
  }
}

</mosaic_0001>

<bundles_post_ra>
// kernel: self_assembly_forward.2
= control target key start
LH: loop header
LB: loop body
LE: loop exit
PB: predicated region body
PF: predicated region fallthrough
CT: control target
= control target key end

     0   :  { %vm19_vm0 = vcmask 519168   ;;  %v118_v1 = vmov 0   ;;  %v119_v2 = vmov 0.0   ;;  %vm55_vm1 = vcmask 523264   ;;  %s163_s1 = inlined_call_operand.vmem [shape: bf16[64,64], index: 1, kind: input, shape index: {}]   ;;  %s164_s2 = inlined_call_operand.vmem [shape: f32[4,1], index: 2, kind: input, shape index: {}]   ;;  %s165_s0 = inlined_call_operand.vmem [shape: bf16[4,64], index: 0, kind: input, shape index: {}]   ;;  %s166_s3 = inlined_call_operand.vmem [shape: bf16[4,64], index: 3, kind: output, shape index: {}]  }
   0x1   :  { %v114_v0 = vld [vmem:[%s163_s1 + $0x18] sm:$0xff]  ;;  %117 = vset.pattern.permute.xlu0 %v118_v1  ;;  %20 = vst.msk [vmem:[#allocation2] sm:$0xf] %vm19_vm0, %v119_v2  ;;  %v79_v3 = vld [vmem:[%s164_s2] sm:$0xf]  ;;  %v113_v4 = vld [vmem:[%s163_s1 + $0x10] sm:$0xff] }
   0x2   :  { %63 = vmatpush.bf16.msra.mxu0 %v114_v0  ;;  %82 = vperm.xlu0 %117, %v79_v3   ;;  %v112_v5 = vld [vmem:[%s163_s1 + $0x8] sm:$0xff]  ;;  %v111_v6 = vld [vmem:[%s163_s1] sm:$0xff]  ;;  %vm88_vm2 = vcmask 517120  }
   0x3   :  { %v22_v7 = vld [vmem:[%s165_s0] sm:$0x3] }
   0x6   :  { %64 = vmatpush.bf16.msra.mxu0 %v113_v4 }
   0x8   :  { %v21_v8 = vld [vmem:[#allocation2] sm:$0xf] }
   0xa   :  { %65 = vmatpush.bf16.msra.mxu0 %v112_v5 }
   0xe   :  { %66 = vmatpush.bf16.msra.mxu0 %v111_v6 }
  0x11   :  { %110 = vmatmul.msk.bf16.vlgmr.msra.gmra.mxu0 %vm55_vm1, %v22_v7 }
  0x74   :  { %v83_v12 = vpop.permute.xlu0 %82 }
  0x8e   :  { %v68_v9 = vpop.f32.mrf.mxu0 }
  0x8f   :  { %v72_v10 = vadd.f32 %v68_v9, %v21_v8 }
  0x91   :  { %74 = vst.msk [vmem:[#allocation2] sm:$0xf] %vm19_vm0, %v72_v10 }
  0x96   :  { %v70_v11 = vpop.f32.mrf.mxu0 }
  0x98   :  { %v78_v13 = vld [vmem:[#allocation2] sm:$0xf] }
  0x99   :  { %v85_v14 = vadd.f32 %v83_v12, %v78_v13 }
  0x9b   :  { %v86_v15 = vmax.f32 %v85_v14, 0.0 }
  0x9d   :  { %v87_v16 = vpack.c.bf16 %v86_v15, %v86_v15 }
  0x9f   :  { %89 = vst.msk [vmem:[%s166_s3] sm:$0x3] %vm88_vm2, %v87_v16 }

// kernel: self_assembly_forward.3
= control target key start
LH: loop header
LB: loop body
LE: loop exit
PB: predicated region body
PF: predicated region fallthrough
CT: control target
= control target key end

     0   :  { %s561_s15 = smov 0   ;;  %s563_s16 = smov 0   ;;  %s607_s0 = inlined_call_operand.vmem [shape: bf16[4,4,16], index: 0, kind: input, shape index: {}]   ;;  %s608_s1 = inlined_call_operand.vmem [shape: bf16[4,16,64], index: 1, kind: input, shape index: {}]   ;;  %s609_s2 = inlined_call_operand.vmem [shape: f32[4,4,64], index: 2, kind: output, shape index: {0}]   ;;  %s610_s3 = inlined_call_operand.vmem [shape: f32[4,4,1], index: 3, kind: output, shape index: {1}]   ;;  %s611_s4 = inlined_call_operand.vmem [shape: f32[4,4,1], index: 4, kind: output, shape index: {2}]  }
   0x1   :  { %s565_s17 = smov 0  }
   0x2 LB: > { %s27_s18 = sadd.s32 1, %s529_s16  ;;  %p470_p0 = scmp.ge.s32.totalorder %s533_s17, 1  ;;  %s533_s17 = sphi %s565_s17, %s15_s17   ;;  %s529_s16 = sphi %s563_s16, %s613_s16   ;;  %s525_s15 = sphi %s561_s15, %s612_s15  }
   0x3   : > { %p29_p1 = scmp.ge.s32.totalorder %s27_s18, 4  ;;  %p195_p2 = scmp.lt.s32.totalorder %s533_s17, 5 }
   0x5   : > { %s615_s18 = smov (%p29_p1, %s27_s18), 0  ;;  %p196_p3 = pnand %p470_p0, %p195_p2 }
   0x6   : > { %p238_p4 = scmp.lt.s32.totalorder (!%p196_p3), %s525_s15, 3 }
   0x7   : > { %199 = sbr.rel (%p196_p3) target bundleno = 273 (0x111), region = 28 }
   0xc   : > { %s617_s15 = smov (!%p238_p4, %s525_s15), 3  ;;  %vm282_vm0 = vcmask 130048   ;;  %vm270_vm1 = vcmask 3072   ;;  %v535_v2 = vmov 0.0   ;;  %vm299_vm2 = vcmask 519168  }
   0xd   : > { %s484_s19 = sshll.u32 %s617_s15, 3  ;;  %s471_s20 = sshll.u32 %s617_s15, 1 }
   0xe   : > { %s249_s23 = scalar_lea.vmem %s608_s1, %s484_s19  ;;  %s241_s26 = scalar_lea.vmem %s607_s0, %s471_s20 }
   0xf   : > { %v485_v0 = vld [vmem:[%s249_s23] sm:$0xff]  ;;  %s474_s27 = sshll.u32 %s617_s15, 2 }
  0x10   : > { %293 = vmatpush.bf16.msra.mxu0 %v485_v0  ;;  %v273_v1 = vld [vmem:[%s241_s26] sm:$0x3]  ;;  %s260_s30 = scalar_lea.vmem %s610_s3, %s474_s27  ;;  %s264_s7 = scalar_lea.vmem %s611_s4, %s474_s27 }
  0x11   : > { %271 = vst.msk [vmem:[%s260_s30] sm:$0xf] %vm270_vm1, %v535_v2  ;;  %s256_s10 = scalar_lea.vmem %s609_s2, %s474_s27 }
  0x12   : > { %272 = vst.msk [vmem:[%s264_s7] sm:$0xf] %vm270_vm1, %v535_v2 }
  0x13   : > { %481 = vmatmul.msk.bf16.vlgmr.msra.gmra.mxu0 %vm282_vm0, %v273_v1 }
  0x18   : > { %v301_v8 = vld [vmem:[%s260_s30] sm:$0xf] }
  0x19   : > { %v308_v11 = vld [vmem:[%s264_s7] sm:$0xf] }
  0x90   : > { %v295_v3 = vpop.f32.mrf.mxu0 }
  0x91   : > { %v302_v4 = vsel %vm299_vm2, %v295_v3, 0.0  ;;  %300 = vst.msk [vmem:[%s256_s10] sm:$0xf] %vm299_vm2, %v295_v3  ;;  %v309_v5 = vmul.f32 %v295_v3, %v295_v3 }
  0x92   : > { %303 = vadd.xlane.f32.xlu0 %v302_v4 }
  0x93   : > { %v310_v7 = vsel %vm299_vm2, %v309_v5, 0.0 }
  0x98   : > { %v297_v6 = vpop.f32.mrf.mxu0 }
  0x9a   : > { %311 = vadd.xlane.f32.xlu0 %v310_v7 }
 0x105   : > { %v304_v9 = vpop.xlane.xlu0 %303 }
 0x106   : > { %v305_v10 = vadd.f32 %v304_v9, %v301_v8 }
 0x108   : > { %307 = vst.msk [vmem:[%s260_s30] sm:$0xf] %vm270_vm1, %v305_v10 }
 0x10d   : > { %v312_v12 = vpop.xlane.xlu0 %311 }
 0x10e   : > { %v313_v13 = vadd.f32 %v312_v12, %v308_v11 }
 0x110   : > { %314 = vst.msk [vmem:[%s264_s7] sm:$0xf] %vm270_vm1, %v313_v13 }
 0x111 PF: > { %s15_s17 = sadd.s32 1, %s533_s17   ;;  %s612_s15 = smov %s529_s16 }
 0x112   : > { %p12_p5 = scmp.ge.s32.totalorder %s15_s17, 6   ;;  %s613_s16 = smov %s615_s18 }
 0x114   :  { %14 = sbr.rel (!%p12_p5) target bundleno = 2 (0x2), region = 89 }

</bundles_post_ra>
